<compile_context>
chip_gen: v6e
topology: v6e:2x2x1
jax: 0.10.0
libtpu: 0.0.40
codegen_flags: <defaults>
</compile_context>

<pallas_src>
import functools

import numpy as np
import jax
import jax.numpy as jnp
from jax import lax
from jax.experimental import pallas as pl
from jax.experimental.pallas import tpu as pltpu


def _erf_f32(x):
    # Abramowitz & Stegun 7.1.26, |err| <= 1.5e-7, f32 math (v5e has no bf16 VPU/EUP).
    a1, a2, a3, a4, a5 = 0.254829592, -0.284496736, 1.421413741, -1.453152027, 1.061405429
    p = 0.3275911
    ax = jnp.abs(x)
    t = 1.0 / (1.0 + p * ax)
    poly = ((((a5 * t + a4) * t + a3) * t + a2) * t + a1) * t
    y = 1.0 - poly * jnp.exp(-ax * ax)
    return jnp.where(x >= 0.0, y, -y)


def _gelu_exact(x):
    # torch.nn.GELU() default: 0.5 * x * (1 + erf(x / sqrt(2)))
    return 0.5 * x * (1.0 + _erf_f32(x * 0.7071067811865476))


def _conv_pool_kernel(x_ref, w1_ref, b1_ref, w2_ref, b2_ref, o_ref, *, Hq, Wq):
    """Per-image body.  x_ref: (Kp, 4*Hq*Wq) bf16 im2col (channel-major, K padded to 128).
    w1_ref: (Cch, Kp) bf16, b1_ref: (Cch, 1) f32, w2_ref: (Cout, Cch) bf16, b2_ref: (Cout, 1) f32.
    o_ref: (Cout, Hq*Wq) f32."""
    hw = Hq * Wq

    # Conv2d(Cin, Cch, k=3, p=1): one MXU matmul, bf16 operands, f32 accumulation.
    acc = jnp.dot(w1_ref[...], x_ref[...], preferred_element_type=jnp.float32)
    acc = acc + b1_ref[...]                                      # (Cch, 4*hw), full 256 lanes

    # GELU on a lane-dense f32 block.
    h1 = _gelu_exact(acc)

    # Conv2d(Cch, Cout, k=1): one MXU matmul.
    h2 = jnp.dot(w2_ref[...], h1.astype(w2_ref.dtype),
                 preferred_element_type=jnp.float32) + b2_ref[...]   # (Cout, 4*hw)

    # MaxPool2d(2, 2): columns are ordered (t, s, hq, wq), so the four pool partners sit in four
    # contiguous 64-column blocks -> pure elementwise max, no scratch, no relayout.
    pooled = jnp.maximum(jnp.maximum(h2[:, 0 * hw:1 * hw], h2[:, 1 * hw:2 * hw]),
                         jnp.maximum(h2[:, 2 * hw:3 * hw], h2[:, 3 * hw:4 * hw]))
    o_ref[...] = pooled.astype(o_ref.dtype)                      # rows=Cout, cols=(hq, wq)


def conv_pool_embedding(x_nchw, w1, b1, w2, b2):
    """x_nchw: (B, Cin, H, W). w1: (Cch, Cin, 3, 3), b1: (Cch,), w2: (Cout, Cch, 1, 1), b2: (Cout,)."""
    B, Cin, H, W = x_nchw.shape
    Cch = w1.shape[0]
    Cout = w2.shape[0]
    assert H % 2 == 0 and W % 2 == 0, "kernel assumes even H and W (MaxPool2d(2,2))"
    Hq, Wq = H // 2, W // 2
    K9 = 9 * Cin
    Kp = ((K9 + 127) // 128) * 128          # pad contraction dim to full lane width
    M = 4 * Hq * Wq                         # = H*W conv outputs per image, phase-major

    # ---- Wrapper-side im2col (XLA-fused), channel-major, bf16 ----------------------------------
    # patches[b, (dy*3+dx)*Cin + ci, i, j] = xpad[b, ci, i+dy, j+dx]  (conv padding = 1)
    xpad = jnp.pad(x_nchw.astype(jnp.float32), ((0, 0), (0, 0), (1, 1), (1, 1)))
    taps = [xpad[:, :, dy:dy + H, dx:dx + W] for dy in range(3) for dx in range(3)]
    pat = jnp.stack(taps, axis=1).reshape(B, K9, H, W)
    # Split output rows/cols into pooling phases: i = 2*hq + t, j = 2*wq + s.
    pat = pat.reshape(B, K9, Hq, 2, Wq, 2)
    pat = jnp.transpose(pat, (0, 1, 3, 5, 2, 4))                 # (B, K9, t, s, hq, wq)
    im2col = pat.reshape(B, K9, M)
    im2col = jnp.pad(im2col, ((0, 0), (0, Kp - K9), (0, 0))).astype(jnp.bfloat16)  # (B, Kp, M)

    # Conv weights reshaped ONCE in the wrapper; bf16 MXU operands, biases stay f32.
    w1_t = jnp.transpose(w1, (0, 2, 3, 1)).reshape(Cch, K9)      # [co, (dy, dx, ci)]
    w1_t = jnp.pad(w1_t, ((0, 0), (0, Kp - K9))).astype(jnp.bfloat16)   # (Cch, Kp)
    w2_t = w2[:, :, 0, 0].astype(jnp.bfloat16)                   # (Cout, Cch)
    b1_c = b1.reshape(Cch, 1).astype(jnp.float32)
    b2_c = b2.reshape(Cout, 1).astype(jnp.float32)

    kernel = functools.partial(_conv_pool_kernel, Hq=Hq, Wq=Wq)

    out_flat = pl.pallas_call(
        kernel,
        out_shape=jax.ShapeDtypeStruct((B, Cout, Hq * Wq), jnp.float32),
        grid_spec=pltpu.PrefetchScalarGridSpec(
            num_scalar_prefetch=0,
            grid=(B,),
            in_specs=[
                pl.BlockSpec((None, Kp, M), lambda b: (b, 0, 0)),     # per-image im2col slab
                pl.BlockSpec((Cch, Kp), lambda b: (0, 0)),            # weights stay resident
                pl.BlockSpec((Cch, 1), lambda b: (0, 0)),
                pl.BlockSpec((Cout, Cch), lambda b: (0, 0)),
                pl.BlockSpec((Cout, 1), lambda b: (0, 0)),
            ],
            out_specs=pl.BlockSpec((None, Cout, Hq * Wq), lambda b: (b, 0, 0)),
        ),
        # B=2 "parallel" steps: shards across v7x's 2 TensorCores; one extra ~0.35us step on
        # single-TC v5e/v6e (see TODO at top about folding B into M there).
        compiler_params=pltpu.CompilerParams(dimension_semantics=("parallel",)),
    )(im2col, w1_t, b1_c, w2_t, b2_c)

    # (B, Cout, Hq*Wq) rows are already (hq, wq)-ordered -> direct NCHW reshape, no transpose.
    return out_flat.reshape(B, Cout, Hq, Wq)


def _reference(x, w1, b1, w2, b2):
    # Pure-JAX reference of the PyTorch module forward (NCHW throughout, f32).
    y = lax.conv_general_dilated(x, w1, (1, 1), ((1, 1), (1, 1)),
                                 dimension_numbers=("NCHW", "OIHW", "NCHW"))
    y = y + b1[None, :, None, None]
    y = jax.nn.gelu(y, approximate=False)
    y = lax.conv_general_dilated(y, w2, (1, 1), ((0, 0), (0, 0)),
                                 dimension_numbers=("NCHW", "OIHW", "NCHW"))
    y = y + b2[None, :, None, None]
    y = lax.reduce_window(y, -jnp.inf, lax.max, (1, 1, 2, 2), (1, 1, 2, 2), "VALID")
    return y


if __name__ == "__main__":
    key = jax.random.PRNGKey(0)
    B, Cin, H, W = 2, 4, 16, 16          # input_dim = 4
    Cch, Cout = 8, 16                    # channel_dim = 8, output_dim = 16
    k1, k2, k3, k4, k5 = jax.random.split(key, 5)

    x = jax.random.normal(k1, (B, Cin, H, W), jnp.float32)
    # Deterministic synthetic parameters (shapes from the module __init__).
    w1 = jax.random.normal(k2, (Cch, Cin, 3, 3), jnp.float32) * 0.2
    b1 = jax.random.normal(k3, (Cch,), jnp.float32) * 0.1
    w2 = jax.random.normal(k4, (Cout, Cch, 1, 1), jnp.float32) * 0.2
    b2 = jax.random.normal(k5, (Cout,), jnp.float32) * 0.1

    out = jax.block_until_ready(conv_pool_embedding(x, w1, b1, w2, b2))
    assert out.shape == (B, Cout, H // 2, W // 2), out.shape

    ref = jax.block_until_ready(_reference(x, w1, b1, w2, b2))
    # bf16 MXU operands -> slightly looser tolerance than a pure-f32 kernel (see perf review).
    np.testing.assert_allclose(np.asarray(out), np.asarray(ref), rtol=3e-2, atol=3e-2)

    print("KERNEL_OK")
</pallas_src>

<mosaic_0001>
module attributes {stable_mosaic.version = 11 : i64} {
  func.func @_conv_pool_kernel(%arg0: i32, %arg1: memref<1x128x256xbf16, #tpu.memory_space<vmem>>, %arg2: memref<8x128xbf16, #tpu.memory_space<vmem>>, %arg3: memref<8x1xf32, #tpu.memory_space<vmem>>, %arg4: memref<16x8xbf16, #tpu.memory_space<vmem>>, %arg5: memref<16x1xf32, #tpu.memory_space<vmem>>, %arg6: memref<1x16x64xf32, #tpu.memory_space<vmem>>) attributes {dimension_semantics = [#tpu.dimension_semantics<parallel>], iteration_bounds = array<i64: 2>, scalar_prefetch = 0 : i64, scratch_operands = 0 : i64, tpu.core_type = #tpu.core_type<tc>, window_params = [{transform_indices = @transform_0, window_bounds = array<i64: 1, 128, 256>}, {pipeline_mode = #tpu.pipeline_mode<synchronous>, transform_indices = @transform_1, window_bounds = array<i64: 8, 128>}, {pipeline_mode = #tpu.pipeline_mode<synchronous>, transform_indices = @transform_2, window_bounds = array<i64: 8, 1>}, {pipeline_mode = #tpu.pipeline_mode<synchronous>, transform_indices = @transform_3, window_bounds = array<i64: 16, 8>}, {pipeline_mode = #tpu.pipeline_mode<synchronous>, transform_indices = @transform_4, window_bounds = array<i64: 16, 1>}, {transform_indices = @transform_5, window_bounds = array<i64: 1, 16, 64>}]} {
    %c0 = arith.constant 0 : index
    %c0_0 = arith.constant 0 : index
    %0 = vector.load %arg2[%c0, %c0_0] : memref<8x128xbf16, #tpu.memory_space<vmem>>, vector<8x128xbf16>
    %c0_1 = arith.constant 0 : index
    %c0_2 = arith.constant 0 : index
    %c0_3 = arith.constant 0 : index
    %1 = vector.load %arg1[%c0_1, %c0_2, %c0_3] : memref<1x128x256xbf16, #tpu.memory_space<vmem>>, vector<1x128x256xbf16>
    %2 = vector.shape_cast %1 : vector<1x128x256xbf16> to vector<128x256xbf16>
    %cst = arith.constant dense<0.000000e+00> : vector<8x256xf32>
    %3 = tpu.matmul %0, %2, %cst {dimension_numbers = #tpu.dot_dimension_numbers<[1], [0], [0], [1], [0, 0, 1, 1], [], []>} : vector<8x128xbf16>, vector<128x256xbf16>, vector<8x256xf32> -> vector<8x256xf32>
    %c0_4 = arith.constant 0 : index
    %c0_5 = arith.constant 0 : index
    %4 = vector.load %arg3[%c0_4, %c0_5] : memref<8x1xf32, #tpu.memory_space<vmem>>, vector<8x1xf32>
    %5 = vector.broadcast %4 : vector<8x1xf32> to vector<8x256xf32>
    %6 = arith.addf %3, %5 : vector<8x256xf32>
    %cst_6 = arith.constant 5.000000e-01 : f32
    %7 = vector.broadcast %cst_6 : f32 to vector<8x256xf32>
    %8 = arith.mulf %7, %6 : vector<8x256xf32>
    %cst_7 = arith.constant 0.707106769 : f32
    %9 = vector.broadcast %cst_7 : f32 to vector<8x256xf32>
    %10 = arith.mulf %6, %9 : vector<8x256xf32>
    %11 = math.absf %10 : vector<8x256xf32>
    %cst_8 = arith.constant 0.327591091 : f32
    %12 = vector.broadcast %cst_8 : f32 to vector<8x256xf32>
    %13 = arith.mulf %12, %11 : vector<8x256xf32>
    %cst_9 = arith.constant 1.000000e+00 : f32
    %14 = vector.broadcast %cst_9 : f32 to vector<8x256xf32>
    %15 = arith.addf %14, %13 : vector<8x256xf32>
    %cst_10 = arith.constant 1.000000e+00 : f32
    %16 = vector.broadcast %cst_10 : f32 to vector<8x256xf32>
    %17 = arith.divf %16, %15 : vector<8x256xf32>
    %cst_11 = arith.constant 1.06140542 : f32
    %18 = vector.broadcast %cst_11 : f32 to vector<8x256xf32>
    %19 = arith.mulf %18, %17 : vector<8x256xf32>
    %cst_12 = arith.constant -1.45315206 : f32
    %20 = vector.broadcast %cst_12 : f32 to vector<8x256xf32>
    %21 = arith.addf %19, %20 : vector<8x256xf32>
    %22 = arith.mulf %21, %17 : vector<8x256xf32>
    %cst_13 = arith.constant 1.42141378 : f32
    %23 = vector.broadcast %cst_13 : f32 to vector<8x256xf32>
    %24 = arith.addf %22, %23 : vector<8x256xf32>
    %25 = arith.mulf %24, %17 : vector<8x256xf32>
    %cst_14 = arith.constant -0.284496725 : f32
    %26 = vector.broadcast %cst_14 : f32 to vector<8x256xf32>
    %27 = arith.addf %25, %26 : vector<8x256xf32>
    %28 = arith.mulf %27, %17 : vector<8x256xf32>
    %cst_15 = arith.constant 0.254829586 : f32
    %29 = vector.broadcast %cst_15 : f32 to vector<8x256xf32>
    %30 = arith.addf %28, %29 : vector<8x256xf32>
    %31 = arith.mulf %30, %17 : vector<8x256xf32>
    %cst_16 = arith.constant 0.000000e+00 : f32
    %32 = vector.broadcast %cst_16 : f32 to vector<8x256xf32>
    %33 = arith.subf %32, %11 : vector<8x256xf32>
    %34 = arith.mulf %33, %11 : vector<8x256xf32>
    %35 = math.exp %34 : vector<8x256xf32>
    %36 = arith.mulf %31, %35 : vector<8x256xf32>
    %cst_17 = arith.constant 1.000000e+00 : f32
    %37 = vector.broadcast %cst_17 : f32 to vector<8x256xf32>
    %38 = arith.subf %37, %36 : vector<8x256xf32>
    %cst_18 = arith.constant 0.000000e+00 : f32
    %39 = vector.broadcast %cst_18 : f32 to vector<8x256xf32>
    %40 = arith.cmpf oge, %10, %39 : vector<8x256xf32>
    %cst_19 = arith.constant 0.000000e+00 : f32
    %41 = vector.broadcast %cst_19 : f32 to vector<8x256xf32>
    %42 = arith.subf %41, %38 : vector<8x256xf32>
    %43 = arith.select %40, %38, %42 : vector<8x256xi1>, vector<8x256xf32>
    %cst_20 = arith.constant 1.000000e+00 : f32
    %44 = vector.broadcast %cst_20 : f32 to vector<8x256xf32>
    %45 = arith.addf %44, %43 : vector<8x256xf32>
    %46 = arith.mulf %8, %45 : vector<8x256xf32>
    %c0_21 = arith.constant 0 : index
    %c0_22 = arith.constant 0 : index
    %47 = vector.load %arg4[%c0_21, %c0_22] : memref<16x8xbf16, #tpu.memory_space<vmem>>, vector<16x8xbf16>
    %48 = arith.truncf %46 : vector<8x256xf32> to vector<8x256xbf16>
    %cst_23 = arith.constant dense<0.000000e+00> : vector<16x256xf32>
    %49 = tpu.matmul %47, %48, %cst_23 {dimension_numbers = #tpu.dot_dimension_numbers<[1], [0], [0], [1], [0, 0, 1, 1], [], []>} : vector<16x8xbf16>, vector<8x256xbf16>, vector<16x256xf32> -> vector<16x256xf32>
    %c0_24 = arith.constant 0 : index
    %c0_25 = arith.constant 0 : index
    %50 = vector.load %arg5[%c0_24, %c0_25] : memref<16x1xf32, #tpu.memory_space<vmem>>, vector<16x1xf32>
    %51 = vector.broadcast %50 : vector<16x1xf32> to vector<16x256xf32>
    %52 = arith.addf %49, %51 : vector<16x256xf32>
    %53 = vector.extract_strided_slice %52 {offsets = [0, 0], sizes = [16, 64], strides = [1, 1]} : vector<16x256xf32> to vector<16x64xf32>
    %54 = vector.extract_strided_slice %52 {offsets = [0, 64], sizes = [16, 64], strides = [1, 1]} : vector<16x256xf32> to vector<16x64xf32>
    %55 = arith.maximumf %53, %54 : vector<16x64xf32>
    %56 = vector.extract_strided_slice %52 {offsets = [0, 128], sizes = [16, 64], strides = [1, 1]} : vector<16x256xf32> to vector<16x64xf32>
    %57 = vector.extract_strided_slice %52 {offsets = [0, 192], sizes = [16, 64], strides = [1, 1]} : vector<16x256xf32> to vector<16x64xf32>
    %58 = arith.maximumf %56, %57 : vector<16x64xf32>
    %59 = arith.maximumf %55, %58 : vector<16x64xf32>
    %c0_26 = arith.constant 0 : index
    %c0_27 = arith.constant 0 : index
    %c0_28 = arith.constant 0 : index
    %60 = vector.load %arg6[%c0_26, %c0_27, %c0_28] : memref<1x16x64xf32, #tpu.memory_space<vmem>>, vector<1x16x64xf32>
    %61 = vector.shape_cast %60 : vector<1x16x64xf32> to vector<16x64xf32>
    %62 = vector.shape_cast %59 : vector<16x64xf32> to vector<1x16x64xf32>
    tpu.vector_store %arg6[%c0_26, %c0_27, %c0_28], %62 {strides = array<i32>} : memref<1x16x64xf32, #tpu.memory_space<vmem>>, vector<1x16x64xf32>,
    return
  }
  func.func @transform_0(%arg0: i32) -> (i32, i32, i32) {
    %c0_i32 = arith.constant 0 : i32
    %c0_i32_0 = arith.constant 0 : i32
    %c0_i32_1 = arith.constant 0 : i32
    return %arg0, %c0_i32, %c0_i32_0 : i32, i32, i32
  }
  func.func @transform_1(%arg0: i32) -> (i32, i32) {
    %c0_i32 = arith.constant 0 : i32
    %c0_i32_0 = arith.constant 0 : i32
    %c0_i32_1 = arith.constant 0 : i32
    return %c0_i32, %c0_i32_0 : i32, i32
  }
  func.func @transform_2(%arg0: i32) -> (i32, i32) {
    %c0_i32 = arith.constant 0 : i32
    %c0_i32_0 = arith.constant 0 : i32
    %c0_i32_1 = arith.constant 0 : i32
    return %c0_i32, %c0_i32_0 : i32, i32
  }
  func.func @transform_3(%arg0: i32) -> (i32, i32) {
    %c0_i32 = arith.constant 0 : i32
    %c0_i32_0 = arith.constant 0 : i32
    %c0_i32_1 = arith.constant 0 : i32
    return %c0_i32, %c0_i32_0 : i32, i32
  }
  func.func @transform_4(%arg0: i32) -> (i32, i32) {
    %c0_i32 = arith.constant 0 : i32
    %c0_i32_0 = arith.constant 0 : i32
    %c0_i32_1 = arith.constant 0 : i32
    return %c0_i32, %c0_i32_0 : i32, i32
  }
  func.func @transform_5(%arg0: i32) -> (i32, i32, i32) {
    %c0_i32 = arith.constant 0 : i32
    %c0_i32_0 = arith.constant 0 : i32
    %c0_i32_1 = arith.constant 0 : i32
    return %arg0, %c0_i32, %c0_i32_0 : i32, i32, i32
  }
}

</mosaic_0001>

<bundles_post_ra>
// kernel: tpu_custom_call.1
= control target key start
LH: loop header
LB: loop body
LE: loop exit
PB: predicated region body
PF: predicated region fallthrough
CT: control target
= control target key end

     0   :  { %10 = vsyncpa [#allocation3], 0  ;;  %s1071_s0 = inlined_call_operand.hbm [shape: bf16[2,128,256], index: 0, kind: input, shape index: {}]   ;;  %s1072_s1 = inlined_call_operand.vmem [shape: bf16[8,128], index: 1, kind: input, shape index: {}]   ;;  %s1073_s2 = inlined_call_operand.vmem [shape: f32[8,1], index: 2, kind: input, shape index: {}]   ;;  %s1074_s3 = inlined_call_operand.vmem [shape: bf16[16,8], index: 3, kind: input, shape index: {}]   ;;  %s1075_s4 = inlined_call_operand.vmem [shape: f32[16,1], index: 4, kind: input, shape index: {}]   ;;  %s1076_s5 = inlined_call_operand.hbm [shape: f32[2,16,64], index: 5, kind: output, shape index: {}]  }
   0x1   :  { %12 = vsyncpa [#allocation3 + $0x1], 0 }
   0x2   :  { %13 = vsyncpa [#allocation4], 0 }
   0x3   :  { %15 = vsyncpa [#allocation4 + $0x1], 0  ;;  %s883_s18 = smov 0   ;;  %s885_s19 = smov 0  }
   0x4   :  { %s887_s20 = smov 0   ;;  %s889_s21 = smov 0  }
   0x5 LB: > { %s904_s22 = sadd.s32 4294967295, %s843_s21   ;;  %s629_s23 = sadd.s32 4294967294, %s843_s21   ;;  %s843_s21 = sphi %s889_s21, %s1091_s21   ;;  %s839_s20 = sphi %s887_s20, %s1090_s20   ;;  %s835_s19 = sphi %s885_s19, %s1089_s19   ;;  %s831_s18 = sphi %s883_s18, %s1088_s18  }
   0x6   : > { %s908_s24 = sadd.s32 1, %s843_s21   ;;  %s28_s25 = sadd.s32 1, %s839_s20 }
   0x7   : > { %s25_s26 = ssub.s32 %s843_s21, %s908_s24  ;;  %p35_p0 = scmp.ne.s32.totalorder %s839_s20, %s835_s19 }
   0x8   : > { %p26_p1 = scmp.eq.s32.totalorder %s25_s26, 0  ;;  %p36_p2 = scmp.eq.s32.totalorder %s843_s21, 0 }
   0x9   : > { %p41_p3 = scmp.ne.s32.totalorder %s835_s19, %s831_s18  ;;  %p42_p4 = scmp.eq.s32.totalorder %s904_s22, 0 }
   0xa   : > { %s920_s27 = scalar_select %p26_p1, %s839_s20, %s28_s25  }
   0xb   : > { %p922_p5 = por %p36_p2, %p35_p0  ;;  %p926_p6 = por %p42_p4, %p41_p3 }
   0xc   : > { %p149_p7 = scmp.eq.s32.totalorder %s904_s22, 1  ;;  %p155_p8 = scmp.eq.s32.totalorder %s629_s23, 1 }
   0xd   : > { %s1080_s29 = scalar_select %p926_p6, 1, 0 }
   0xe   : > { %p676_p10 = scmp.lt.s32.totalorder %s843_s21, 2  ;;  %p933_p11 = por %p149_p7, %p35_p0 }
   0xf   : > { %p937_p12 = por %p155_p8, %p41_p3  ;;  %s187_s7 = sand.u32 1, %s839_s20  }
  0x10   : > { %s1081_s30 = scalar_select %p933_p11, 1, 0 }
  0x11   : > { %s1082_s6 = scalar_select %p937_p12, 1, 0 }
  0x12   : > { %s662_s8 = sshll.u32 %s843_s21, 11  ;;  %s632_s9 = sshll.u32 %s187_s7, 7 }
  0x13   : > { %s946_s12 = scalar_lea.hbm %s1071_s0, %s662_s8  ;;  %s191_s13 = scalar_lea.vmem [#allocation2], %s632_s9 }
  0x14   : > { %s198_s14 = sshll.u32 %s191_s13, 4  ;;  %p950_p13 = pnand %p676_p10, %p922_p5  ;;  %s954_s14 = int_to_ptr.vmem [resolvable:$true] %s198_s14 }
  0x15   : > { %s956_s16 = scalar_lea.sflag [#allocation3], %s187_s7  ;;  %s751_s17 = scalar_lea.hbm %s946_s12, 2048 }
  0x16   : > { %p752_p0 = scmp.ne.s32.totalorder %s946_s12, %s751_s17  ;;  %p753_p1 = pneg %p950_p13 }
  0x17   : > { %s756_s26 = scalar_lea.hbm %s1071_s0, 4096  ;;  %p757_p4 = scmp.lt.s32.totalorder %s946_s12, %s1071_s0 }
  0x18   : > { %p754_p2 = pnand %p753_p1, %p752_p0  ;;  %p758_p5 = scmp.lt.s32.totalorder %s756_s26, %s751_s17 }
  0x1a   : > { %p755_p3 = pneg %p754_p2  ;;  %p759_p7 = por %p758_p5, %p757_p4 }
  0x1c   : > { %p760_p8 = pnand %p759_p7, %p755_p3 }
  0x1e   : > { %763 = shalt.err (!%p760_p8)
}
  0x1f   : > { %s764_s7 = scalar_lea.vmem %s954_s14, 2048  ;;  %s845_s9 = smov [#allocation2]  }
  0x20   : > { %p765_p10 = scmp.ne.s32.totalorder %s954_s14, %s764_s7  ;;  %s769_s10 = sshll.u32 %s845_s9, 4  ;;  %s770_s10 = int_to_ptr.vmem [resolvable:$false] %s769_s10 }
  0x21   : > { %s771_s11 = scalar_lea.vmem %s770_s10, 4096  ;;  %p772_p2 = scmp.lt.s32.totalorder %s954_s14, %s770_s10 }
  0x22   : > { %p767_p9 = pnand %p765_p10, %p753_p1  ;;  %p773_p12 = scmp.lt.s32.totalorder %s771_s11, %s764_s7 }
  0x24   : > { %p768_p0 = pneg %p767_p9  ;;  %p774_p11 = por %p773_p12, %p772_p2 }
  0x26   : > { %p775_p6 = pnand %p774_p11, %p768_p0 }
  0x28   : > { %778 = shalt.err (!%p775_p6)
}
  0x29   : > { %s846_s13 = smov 128   ;;  %s847_s17 = smov 8  }
  0x2a   : > { %671 = dma.hbm_to_vmem [thread:$0]  (!%p950_p13), %s946_s12, 2048, %s954_s14, %s956_s16, %s846_s13, %s846_s13, %s847_s17  }
  0x2b   : > { %p635_p9 = scmp.ge.s32.totalorder %s843_s21, 1  ;;  %p206_p1 = scmp.lt.s32.totalorder %s843_s21, 3 }
  0x2d   : > { %p207_p3 = pnand %p635_p9, %p206_p1 }
  0x2e   : > { %s980_s23 = sand.u32 (!%p207_p3), 1, %s835_s19   ;;  %p1084_p6 = scmp.ne.s32.totalorder (!%p207_p3), %s1080_s29, 0 }
  0x2f   : > { %210 = sbr.rel (%p207_p3) target bundleno = 678 (0x2a6), region = 40  ;;  %s636_s25 = sshll.u32 (!%p207_p3), %s980_s23, 7 }
  0x30   : > { %s213_s26 = scalar_lea.sflag (!%p207_p3), [#allocation3], %s980_s23  ;;  %s984_s28 = scalar_lea.vmem (!%p207_p3), [#allocation2], %s636_s25 }
  0x34   : > { %822 = dma.done.wait (%p1084_p6), %s213_s26, 2048  }
  0x35   : > { %824 = vsyncadd (%p1084_p6), %s213_s26, 4294965248  ;;  %v848_v0 = vmov 0   ;;  %v718_v1 = vld [vmem:[%s984_s28 + $0x74] ss:$8 sps:$4 sm:$0xff]   ;;  %v720_v2 = vld [vmem:[%s984_s28 + $0x70] ss:$8 sps:$4 sm:$0xff]  }
  0x36   : > { %379 = vmatprep.mubr.bf16.mxu0 %v848_v0  ;;  %716 = vset.pattern.permute.xlu0 %v848_v0  ;;  %v721_v3 = vld [vmem:[%s984_s28 + $0x64] ss:$8 sps:$4 sm:$0xff]   ;;  %v723_v4 = vld [vmem:[%s984_s28 + $0x60] ss:$8 sps:$4 sm:$0xff]   ;;  %v724_v5 = vld [vmem:[%s984_s28 + $0x54] ss:$8 sps:$4 sm:$0xff]  }
  0x37   : > { %506 = vmatprep.mubr.bf16.mxu1 %v848_v0  ;;  %717 = vset.pattern.permute.xlu1 %v848_v0  ;;  %v726_v6 = vld [vmem:[%s984_s28 + $0x50] ss:$8 sps:$4 sm:$0xff]   ;;  %v727_v7 = vld [vmem:[%s984_s28 + $0x44] ss:$8 sps:$4 sm:$0xff]   ;;  %v729_v8 = vld [vmem:[%s984_s28 + $0x40] ss:$8 sps:$4 sm:$0xff]  }
  0x38   : > { %347 = vmatprep.subr.bf16.mxu0 %v718_v1  ;;  %v261_v9 = vld [vmem:[%s1073_s2] sm:$0xff]  ;;  %v730_v10 = vld [vmem:[%s984_s28 + $0x34] ss:$8 sps:$4 sm:$0xff]   ;;  %v732_v12 = vld [vmem:[%s984_s28 + $0x30] ss:$8 sps:$4 sm:$0xff]   ;;  %vm467_vm2 = vcmask 1043456  }
  0x39   : > { %348 = vmatpush1.bf16.msra.mxu0 %v720_v2  ;;  %264 = vperm.xlu0 %716, %v261_v9   ;;  %v446_v11 = vld [vmem:[%s1075_s4] sm:$0xff]  ;;  %v736_v15 = vld [vmem:[%s984_s28 + $0x14] ss:$8 sps:$4 sm:$0xff]   ;;  %v738_v16 = vld [vmem:[%s984_s28 + $0x10] ss:$8 sps:$4 sm:$0xff]   ;;  %vm463_vm3 = vcmask 64512  }
  0x3a   : > { %349 = vmatprep.subr.bf16.mxu0 %v721_v3  ;;  %v733_v13 = vld [vmem:[%s984_s28 + $0x24] ss:$8 sps:$4 sm:$0xff]   ;;  %v735_v14 = vld [vmem:[%s984_s28 + $0x20] ss:$8 sps:$4 sm:$0xff]   ;;  %s849_s13 = smov 64   ;;  %s637_s17 = sshll.u32 %s980_s23, 4 }
  0x3b   : > { %v739_v17 = vld [vmem:[%s984_s28 + $0x4] ss:$8 sps:$4 sm:$0xff]   ;;  %v741_v18 = vld [vmem:[%s984_s28] ss:$8 sps:$4 sm:$0xff]   ;;  %vm539_vm4 = vcmask 523264   ;;  %s663_s25 = sshll.u32 %s904_s22, 8 }
  0x3c   : > { %v244_v19 = vld [vmem:[%s1072_s1] sm:$0xf]  ;;  %v447_v20 = vld [vmem:[%s1075_s4 + $0x8] sm:$0xff]  ;;  %s242_s26 = scalar_lea.vmem [#allocation5], %s637_s17  ;;  %s1026_s14 = scalar_lea.hbm %s1076_s5, %s663_s25 }
  0x3d   : > { %350 = vmatpush1.bf16.msra.mxu0 %v723_v4  ;;  %450 = vperm.xlu0 %716, %v446_v11   ;;  %s556_s28 = sshll.u32 %s242_s26, 4  ;;  %s543_s15 = scalar_lea.sflag [#allocation4], %s980_s23  ;;  %s1028_s28 = int_to_ptr.vmem [resolvable:$true] %s556_s28 }
  0x3e   : > { %351 = vmatprep.subr.bf16.mxu0 %v724_v5  ;;  %455 = vperm.xlu1 %717, %v447_v20   ;;  %s779_s22 = scalar_lea.vmem %s1028_s28, 256  ;;  %p1085_p12 = scmp.ne.s32.totalorder %s1081_s30, 0 }
  0x3f   : > { %p780_p11 = scmp.ne.s32.totalorder %s1028_s28, %s779_s22  ;;  %s850_s16 = smov [#allocation5]  }
  0x40   : > { %s783_s8 = sshll.u32 %s850_s16, 4  ;;  %s784_s8 = int_to_ptr.vmem [resolvable:$false] %s783_s8 }
  0x41   : > { %352 = vmatpush1.bf16.msra.mxu0 %v726_v6  ;;  %p781_p13 = pnand %p780_p11, %p1085_p12  ;;  %s785_s7 = scalar_lea.vmem %s784_s8, 512 }
  0x42   : > { %353 = vmatprep.subr.bf16.mxu0 %v727_v7  ;;  %p786_p5 = scmp.lt.s32.totalorder %s1028_s28, %s784_s8  ;;  %p787_p7 = scmp.lt.s32.totalorder %s785_s7, %s779_s22 }
  0x43   : > { %p782_p4 = pneg %p781_p13 }
  0x44   : > { %p788_p8 = por %p787_p7, %p786_p5 }
  0x45   : > { %354 = vmatpush1.bf16.msra.mxu0 %v729_v8 }
  0x46   : > { %355 = vmatprep.subr.bf16.mxu0 %v730_v10  ;;  %p789_p10 = pnand %p788_p8, %p782_p4 }
  0x49   : > { %356 = vmatpush1.bf16.msra.mxu0 %v732_v12 }
  0x4a   : > { %357 = vmatprep.subr.bf16.mxu0 %v733_v13 }
  0x4d   : > { %358 = vmatpush1.bf16.msra.mxu0 %v735_v14 }
  0x4e   : > { %359 = vmatprep.subr.bf16.mxu0 %v736_v15 }
  0x51   : > { %360 = vmatpush1.bf16.msra.mxu0 %v738_v16 }
  0x52   : > { %361 = vmatprep.subr.bf16.mxu0 %v739_v17  ;;  %v742_v17 = vld [vmem:[%s1074_s3] sm:$0xff]  }
  0x55   : > { %362 = vmatpush1.bf16.msra.mxu0 %v741_v18 }
  0x58   : > { %380 = vmatmul.mubr.bf16.vlgmr.msra.gmra.mxu0 %v244_v19 }
  0xb4   : > { %v265_v21 = vpop.permute.xlu0 %264 }
  0xb8   : > { %v451_v18 = vpop.permute.xlu0 %450 }
 0x118   : > { %v381_v22 = vpop.f32.mrf.mxu0 }
 0x119   : > { %v382_v23 = vadd.f32 %v381_v22, %v265_v21  ;;  %v456_v22 = vpop.permute.xlu1 %455 }
 0x11a   : > { %v383_v24 = vpop.f32.mrf.mxu0 }
 0x11b   : > { %v390_v25 = vmul.f32 0.70710677, %v382_v23  ;;  %v384_v26 = vadd.f32 %v383_v24, %v265_v21  ;;  %v388_v6 = vmul.f32 0.5, %v382_v23 }
 0x11c   : > { %v385_v27 = vpop.f32.mrf.mxu0 }
 0x11d   : > { %v392_v28 = vand.u32 2147483647, %v390_v25  ;;  %v391_v29 = vmul.f32 0.70710677, %v384_v26  ;;  %vm432_vm0 = vcmp.ge.f32.partialorder %v390_v25, 0.0  ;;  %v389_v11 = vmul.f32 0.5, %v384_v26 }
 0x11e   : > { %v386_v30 = vpop.f32.mrf.mxu0 }
 0x11f   : > { %v394_v31 = vmul.f32 0.3275911, %v392_v28  ;;  %v393_v32 = vand.u32 2147483647, %v391_v29  ;;  %v420_v36 = vsub.f32 0.0, %v392_v28  ;;  %vm433_vm1 = vcmp.ge.f32.partialorder %v391_v29, 0.0 }
 0x121   : > { %v396_v33 = vadd.f32 1.0, %v394_v31  ;;  %v395_v34 = vmul.f32 0.3275911, %v393_v32  ;;  %v421_v37 = vsub.f32 0.0, %v393_v32  ;;  %v422_v38 = vmul.f32 %v420_v36, %v392_v28 }
 0x123   : > { %743 = vrcp.f32 %v396_v33  ;;  %v397_v35 = vadd.f32 1.0, %v395_v34  ;;  %v423_v40 = vmul.f32 %v421_v37, %v393_v32  ;;  %v424_v41 = vmul.f32 1.442695, %v422_v38 }
 0x125   : > { %745 = vrcp.f32 %v397_v35  ;;  %v426_v45 = vmul.f32 1.442695, %v423_v40 }
 0x126   : > { %747 = vpow2.f32 %v424_v41 }
 0x127   : > { %749 = vpow2.f32 %v426_v45 }
 0x130   : > { %v744_v39 = vpop.eup %743 }
 0x131   : > { %v402_v42 = vmul.f32 1.0614054, %v744_v39 }
 0x132   : > { %v746_v43 = vpop.eup %745 }
 0x133   : > { %v404_v44 = vadd.f32 -1.4531521, %v402_v42  ;;  %v403_v46 = vmul.f32 1.0614054, %v746_v43  ;;  %v748_v60 = vpop.eup %747 }
 0x134   : > { %v750_v0 = vpop.eup %749 }
 0x135   : > { %v406_v47 = vmul.f32 %v744_v39, %v404_v44  ;;  %v405_v48 = vadd.f32 -1.4531521, %v403_v46 }
 0x137   : > { %v408_v49 = vadd.f32 1.4214138, %v406_v47  ;;  %v407_v50 = vmul.f32 %v746_v43, %v405_v48 }
 0x139   : > { %v410_v51 = vmul.f32 %v744_v39, %v408_v49  ;;  %v409_v52 = vadd.f32 1.4214138, %v407_v50 }
 0x13b   : > { %v412_v53 = vadd.f32 -0.28449672, %v410_v51  ;;  %v411_v54 = vmul.f32 %v746_v43, %v409_v52 }
 0x13d   : > { %v414_v55 = vmul.f32 %v744_v39, %v412_v53  ;;  %v413_v56 = vadd.f32 -0.28449672, %v411_v54 }
 0x13f   : > { %v416_v57 = vadd.f32 0.2548296, %v414_v55  ;;  %v415_v58 = vmul.f32 %v746_v43, %v413_v56 }
 0x141   : > { %v418_v59 = vmul.f32 %v744_v39, %v416_v57  ;;  %v417_v61 = vadd.f32 0.2548296, %v415_v58 }
 0x143   : > { %v428_v62 = vmul.f32 %v748_v60, %v418_v59  ;;  %v419_v63 = vmul.f32 %v746_v43, %v417_v61 }
 0x145   : > { %v430_v1 = vsub.f32 1.0, %v428_v62  ;;  %v429_v2 = vmul.f32 %v750_v0, %v419_v63 }
 0x147   : > { %v434_v3 = vsub.f32 0.0, %v430_v1  ;;  %v431_v4 = vsub.f32 1.0, %v429_v2 }
 0x149   : > { %v436_v5 = vsel %vm432_vm0, %v430_v1, %v434_v3  ;;  %v435_v7 = vsub.f32 0.0, %v431_v4 }
 0x14a   : > { %v438_v8 = vadd.f32 1.0, %v436_v5 }
 0x14b   : > { %v437_v9 = vsel %vm433_vm1, %v431_v4, %v435_v7 }
 0x14c   : > { %v440_v10 = vmul.f32 %v438_v8, %v388_v6  ;;  %v439_v12 = vadd.f32 1.0, %v437_v9 }
 0x14e   : > { %v441_v13 = vmul.f32 %v439_v12, %v389_v11  ;;  %v444_v14 = vpack.c.bf16 %v440_v10, %v440_v10 }
 0x150   : > { %v445_v15 = vpack.c.bf16 %v441_v13, %v441_v13  ;;  %v469_v16 = vsel %vm467_vm2, %v444_v14, 0 }
 0x152   : > { %655 = vmatprep.subr.msk.bf16.mxu1 %vm467_vm2, %v445_v15 }
 0x153   : > { %489 = vmatpush1.bf16.msra.mxu1 %v469_v16 }
 0x156   : > { %656 = vmatmul.mubr.msk.bf16.vlgmr.msra.gmra.mxu1 %vm463_vm3, %v742_v17 }
 0x216   : > { %v508_v19 = vpop.f32.mrf.mxu1 }
 0x217   : > { %v509_v20 = vadd.f32 %v508_v19, %v451_v18 }
 0x218   : > { %v510_v21 = vpop.f32.mrf.mxu1 }
 0x219   : > { %519 = vrot.lane.b32.xlu1 %v509_v20, %s849_s13  ;;  %v511_v24 = vadd.f32 %v510_v21, %v451_v18 }
 0x21a   : > { %v512_v23 = vpop.f32.mrf.mxu1 }
 0x21b   : > { %v513_v25 = vadd.f32 %v512_v23, %v456_v22 }
 0x21c   : > { %v514_v26 = vpop.f32.mrf.mxu1 }
 0x21d   : > { %521 = vrot.lane.b32.xlu0 %v513_v25, %s849_s13  ;;  %529 = vrot.lane.b32.xlu1 %v511_v24, %s849_s13  ;;  %v515_v27 = vadd.f32 %v514_v26, %v456_v22 }
 0x221   : > { %531 = vrot.lane.b32.xlu0 %v515_v27, %s849_s13 }
 0x28b   : > { %v520_v28 = vpop.permute.xlu1 %519 }
 0x28c   : > { %v525_v31 = vmax.f32 %v509_v20, %v520_v28 }
 0x28f   : > { %v522_v29 = vpop.permute.xlu0 %521  ;;  %v530_v30 = vpop.permute.xlu1 %529 }
 0x290   : > { %v535_v32 = vmax.f32 %v511_v24, %v530_v30  ;;  %v526_v35 = vmax.f32 %v513_v25, %v522_v29 }
 0x292   : > { %v537_v33 = vmax.f32 %v525_v31, %v535_v32 }
 0x293   : > { %v532_v34 = vpop.permute.xlu0 %531 }
 0x294   : > { %540 = vst.msk [vmem:[%s242_s26] sm:$0xff] %vm539_vm4, %v537_v33  ;;  %v536_v36 = vmax.f32 %v515_v27, %v532_v34 }
 0x296   : > { %v538_v37 = vmax.f32 %v526_v35, %v536_v36 }
 0x298   : > { %541 = vst.msk [vmem:[%s242_s26 + $0x8] sm:$0xff] %vm539_vm4, %v538_v37 }
 0x299   : > { %792 = shalt.err (!%p789_p10)
}
 0x29a   : > { %s793_s9 = scalar_lea.hbm %s1026_s14, 256  ;;  %s797_s13 = scalar_lea.hbm %s1076_s5, 512 }
 0x29b   : > { %p794_p0 = scmp.ne.s32.totalorder %s1026_s14, %s793_s9  ;;  %p798_p1 = scmp.lt.s32.totalorder %s1026_s14, %s1076_s5 }
 0x29c   : > { %p799_p3 = scmp.lt.s32.totalorder %s797_s13, %s793_s9 }
 0x29d   : > { %p795_p2 = pnand %p794_p0, %p1085_p12 }
 0x29e   : > { %p800_p6 = por %p799_p3, %p798_p1 }
 0x29f   : > { %p796_p9 = pneg %p795_p2 }
 0x2a1   : > { %p801_p11 = pnand %p800_p6, %p796_p9 }
 0x2a3   : > { %804 = shalt.err (!%p801_p11)
}
 0x2a4   : > { %s851_s26 = smov 128   ;;  %s852_s29 = smov 8  }
 0x2a5   : > { %666 = dma.vmem_to_hbm [thread:$0]  (%p1085_p12), %s1028_s28, 256, %s1026_s14, %s543_s15, %s851_s26, %s851_s26, %s852_s29  }
 0x2a6 PF: > { %s571_s12 = sand.u32 1, %s831_s18   ;;  %p1086_p13 = scmp.ne.s32.totalorder %s1082_s6, 0 }
 0x2a7   : > { %p1087_p4 = scmp.ge.s32.totalorder %s843_s21, 2  ;;  %s572_s22 = scalar_lea.sflag [#allocation4], %s571_s12 }
 0x2a9   : > { %p673_p5 = pnand %p1087_p4, %p1086_p13 }
 0x2ab   : > { %p674_p7 = pneg %p673_p5 }
 0x2ad   : > { %826 = dma.done.wait (%p674_p7), %s572_s22, 256  }
 0x2ae   : > { %828 = vsyncadd (%p674_p7), %s572_s22, 4294967040  ;;  %p18_p8 = scmp.ge.s32.totalorder %s908_s24, 4   ;;  %s1088_s18 = smov %s835_s19 }
 0x2af   : > { %s1089_s19 = smov %s839_s20  ;;  %s1090_s20 = smov %s920_s27 }
 0x2b0   : > { %s1091_s21 = smov %s908_s24  ;;  %20 = sbr.rel (!%p18_p8) target bundleno = 5 (0x5), region = 85 }
 0x2b5   :  { %577 = vsyncpa [#allocation3], 1 }
 0x2b6   :  { %579 = vsyncpa [#allocation3 + $0x1], 1 }
 0x2b7   :  { %580 = vsyncpa [#allocation4], 1 }
 0x2b8   :  { %582 = vsyncpa [#allocation4 + $0x1], 1 }

</bundles_post_ra>
